<compile_context>
chip_gen: v5e
topology: v5e:2x2
jax: 0.10.0
libtpu: 0.0.40
codegen_flags: <defaults>
</compile_context>

<pallas_src>
import functools

import jax
import jax.numpy as jnp
from jax.experimental import pallas as pl
from jax.experimental.pallas import tpu as pltpu


# ----------------------------------------------------------------------------- planning utils


def _vmem_capacity_bytes():
    try:
        return int(pltpu.get_tpu_info().vmem_capacity_bytes)
    except Exception:
        return 64 * 1024 * 1024  # conservative: v7x per-TensorCore VMEM


def _prep_row_tile(B, D, budget):
    """Row tile for the normalization pre-kernel (full-D blocks)."""
    if B < 8:
        return B
    for t in (512, 256, 128, 64, 32, 16, 8):
        # ~ (2 in + 2 out) full-D blocks, double buffered, f32.
        if B % t == 0 and 32 * t * D <= budget:
            return t
    return B


def _plan_tiles(B, D, budget):
    """(TR, TC, TD) for the main kernel, VMEM-budgeted and megacore-friendly."""
    # Feature-dim chunk (innermost "arbitrary" grid axis); full D when it's small.
    TD = D
    if D > 1024 and D % 128 == 0:
        for t in (1024, 512, 256, 128):
            if D % t == 0:
                TD = t
                break
    if B < 128:
        return B, B, TD  # tiny batch: single full block

    def est(t):  # rough per-step bytes: 4 dbl-buffered (t,TD) blocks + 4 sims + temps (f32)
        return 16 * TD * (2 * t) + 32 * t * t

    best = None
    for t in (512, 256, 128):
        if B % t != 0 or est(t) > budget:
            continue
        if best is None:
            best = t
        if B // t >= 2:  # prefer >=2 row blocks: "parallel" axis feeds both v7x TensorCores
            best = t
            break
    if best is None:
        best = 128 if B % 128 == 0 else B
    return best, best, TD


# ------------------------------------------------------------------- pre-kernel: normalization


def _prep_kernel(xi_ref, xj_ref, zi_ref, zj_ref, pos_ref, si_ref, sj_ref, *, inv_sqrt_temp):
    xi = xi_ref[...].astype(jnp.float32)
    xj = xj_ref[...].astype(jnp.float32)
    # F.normalize(x, dim=1): x / max(||x||, 1e-12) == x * rsqrt(max(||x||^2, 1e-24)),
    # with rsqrt(temperature) folded in so the similarity comes out of the MXU already / temp.
    zi = xi * (jax.lax.rsqrt(jnp.maximum(jnp.sum(xi * xi, axis=1, keepdims=True), 1e-24))
               * inv_sqrt_temp)
    zj = xj * (jax.lax.rsqrt(jnp.maximum(jnp.sum(xj * xj, axis=1, keepdims=True), 1e-24))
               * inv_sqrt_temp)
    zi_ref[...] = zi
    zj_ref[...] = zj
    pos_ref[...] = jnp.sum(zi * zj, axis=1, keepdims=True)  # positive logit, already / temp
    si_ref[...] = jnp.sum(zi * zi, axis=1, keepdims=True)   # exact self-sim / temp (row k)
    sj_ref[...] = jnp.sum(zj * zj, axis=1, keepdims=True)   # exact self-sim / temp (row k+B)


# ---------------------------------------------------------------- main kernel: sim/exp/rowsum


def _contrast_kernel(zi_r_ref, zj_r_ref, zi_c_ref, zj_c_ref,      # inputs (normalized)
                     pos_ref, self_i_ref, self_j_ref,             # per-row hoisted terms
                     rows_ref,                                    # output: per-row loss terms
                     sii_ref, sij_ref, sji_ref, sjj_ref,          # (TR,TC) partial-sim scratch
                     acc_i_ref, acc_j_ref):                       # (TR,1) running exp-sums
    c = pl.program_id(1)
    nc = pl.num_programs(1)
    d = pl.program_id(2)
    nd = pl.num_programs(2)

    @pl.when(jnp.logical_and(c == 0, d == 0))
    def _():
        acc_i_ref[...] = jnp.zeros_like(acc_i_ref)
        acc_j_ref[...] = jnp.zeros_like(acc_j_ref)

    @pl.when(d == 0)
    def _():
        sii_ref[...] = jnp.zeros_like(sii_ref)
        sij_ref[...] = jnp.zeros_like(sij_ref)
        sji_ref[...] = jnp.zeros_like(sji_ref)
        sjj_ref[...] = jnp.zeros_like(sjj_ref)

    zi_r = zi_r_ref[...]
    zj_r = zj_r_ref[...]
    zi_c = zi_c_ref[...]
    zj_c = zj_c_ref[...]

    def rowdot(a, b):  # (T, TD) x (T', TD) -> (T, T'), contract feature dim on the MXU
        return jax.lax.dot_general(a, b, (((1,), (1,)), ((), ())),
                                   preferred_element_type=jnp.float32,
                                   precision=jax.lax.Precision.HIGHEST)

    # 2x2 block structure of the scaled similarity matrix (no concatenate, no masks),
    # grouped by shared RHS so the MXU keeps the same weights staged across matmuls.
    sii_ref[...] += rowdot(zi_r, zi_c)
    sji_ref[...] += rowdot(zj_r, zi_c)
    sij_ref[...] += rowdot(zi_r, zj_c)
    sjj_ref[...] += rowdot(zj_r, zj_c)

    @pl.when(d == nd - 1)
    def _():
        # Fuse the two exps with a VPU add before the single XLU lane-reduce per view.
        acc_i_ref[...] += jnp.sum(jnp.exp(sii_ref[...]) + jnp.exp(sij_ref[...]),
                                  axis=1, keepdims=True)
        acc_j_ref[...] += jnp.sum(jnp.exp(sji_ref[...]) + jnp.exp(sjj_ref[...]),
                                  axis=1, keepdims=True)

    @pl.when(jnp.logical_and(c == nc - 1, d == nd - 1))
    def _():
        # Drop the exact per-row self term (robust even for all-zero input rows), then combine
        # row k (view i) and row k+B (view j) in log-space.
        denom_i = acc_i_ref[...] - jnp.exp(self_i_ref[...])
        denom_j = acc_j_ref[...] - jnp.exp(self_j_ref[...])
        rows_ref[...] = jnp.log(denom_i) + jnp.log(denom_j) - 2.0 * pos_ref[...]


# --------------------------------------------------------------------------------- entry point


def contrast_loss(x_i, x_j, temperature=0.5):
    B, D = x_i.shape
    assert x_j.shape == (B, D)

    capacity = _vmem_capacity_bytes()
    budget = capacity // 2
    vmem_limit = int(min(capacity * 3 // 4, 96 * 2 ** 20))

    # --- pre-pass: normalize (+ fold rsqrt(temp)) and hoist the per-row full-D terms -------
    TRP = _prep_row_tile(B, D, budget)
    prep = pl.pallas_call(
        functools.partial(_prep_kernel, inv_sqrt_temp=float(temperature) ** -0.5),
        out_shape=(jax.ShapeDtypeStruct((B, D), jnp.float32),
                   jax.ShapeDtypeStruct((B, D), jnp.float32),
                   jax.ShapeDtypeStruct((B, 1), jnp.float32),
                   jax.ShapeDtypeStruct((B, 1), jnp.float32),
                   jax.ShapeDtypeStruct((B, 1), jnp.float32)),
        grid_spec=pltpu.PrefetchScalarGridSpec(
            num_scalar_prefetch=0,
            grid=(B // TRP,),
            in_specs=[pl.BlockSpec((TRP, D), lambda r: (r, 0)),
                      pl.BlockSpec((TRP, D), lambda r: (r, 0))],
            out_specs=[pl.BlockSpec((TRP, D), lambda r: (r, 0)),
                       pl.BlockSpec((TRP, D), lambda r: (r, 0)),
                       pl.BlockSpec((TRP, 1), lambda r: (r, 0)),
                       pl.BlockSpec((TRP, 1), lambda r: (r, 0)),
                       pl.BlockSpec((TRP, 1), lambda r: (r, 0))]),
        compiler_params=pltpu.CompilerParams(
            dimension_semantics=("parallel",),
            vmem_limit_bytes=vmem_limit),
    )
    z_i, z_j, pos, self_i, self_j = prep(x_i, x_j)

    # --- main pass: flash-style (row x col x D-chunk) accumulation of the exp-sums ----------
    TR, TC, TD = _plan_tiles(B, D, budget)
    rows = pl.pallas_call(
        _contrast_kernel,
        out_shape=jax.ShapeDtypeStruct((B, 1), jnp.float32),
        grid_spec=pltpu.PrefetchScalarGridSpec(
            num_scalar_prefetch=0,
            grid=(B // TR, B // TC, D // TD),
            in_specs=[
                pl.BlockSpec((TR, TD), lambda r, c, d: (r, d)),   # z_i row block
                pl.BlockSpec((TR, TD), lambda r, c, d: (r, d)),   # z_j row block
                pl.BlockSpec((TC, TD), lambda r, c, d: (c, d)),   # z_i column block
                pl.BlockSpec((TC, TD), lambda r, c, d: (c, d)),   # z_j column block
                pl.BlockSpec((TR, 1), lambda r, c, d: (r, 0)),    # pos (already / temp)
                pl.BlockSpec((TR, 1), lambda r, c, d: (r, 0)),    # self-sim / temp, view i
                pl.BlockSpec((TR, 1), lambda r, c, d: (r, 0)),    # self-sim / temp, view j
            ],
            out_specs=pl.BlockSpec((TR, 1), lambda r, c, d: (r, 0)),
            scratch_shapes=[
                pltpu.VMEM((TR, TC), jnp.float32),   # partial sim: i rows x i cols
                pltpu.VMEM((TR, TC), jnp.float32),   # partial sim: i rows x j cols
                pltpu.VMEM((TR, TC), jnp.float32),   # partial sim: j rows x i cols
                pltpu.VMEM((TR, TC), jnp.float32),   # partial sim: j rows x j cols
                pltpu.VMEM((TR, 1), jnp.float32),    # running exp-sum, view-i rows
                pltpu.VMEM((TR, 1), jnp.float32),    # running exp-sum, view-j rows
            ]),
        compiler_params=pltpu.CompilerParams(
            dimension_semantics=("parallel", "arbitrary", "arbitrary"),
            vmem_limit_bytes=vmem_limit),
    )(z_i, z_j, z_i, z_j, pos, self_i, self_j)

    # Tiny epilogue: mean of the 2B per-row loss terms (each rows[k] already sums two rows).
    return jnp.sum(rows) / (2.0 * B)


# ---------------------------------------------------------------------------------- reference


def _contrast_ref(x_i, x_j, temperature=0.5):
    """Pure-JAX reference mirroring the PyTorch forward exactly."""
    B = x_i.shape[0]

    def l2norm(x):
        n = jnp.sqrt(jnp.sum(x * x, axis=1, keepdims=True))
        return x / jnp.maximum(n, 1e-12)

    z = jnp.concatenate([l2norm(x_i), l2norm(x_j)], axis=0)
    sim = jnp.dot(z, z.T, precision=jax.lax.Precision.HIGHEST)
    sim_ij = jnp.diagonal(sim, offset=B)
    sim_ji = jnp.diagonal(sim, offset=-B)
    pos = jnp.concatenate([sim_ij, sim_ji], axis=0)
    nom = jnp.exp(pos / temperature)
    neg_mask = 1.0 - jnp.eye(2 * B, dtype=jnp.float32)
    denom = jnp.sum(neg_mask * jnp.exp(sim / temperature), axis=1)
    return jnp.sum(-jnp.log(nom / denom)) / (2.0 * B)


if __name__ == "__main__":
    key = jax.random.PRNGKey(0)
    k1, k2 = jax.random.split(key)
    B, D = 4, 32  # batch_size=4 projections of dim 32
    x_i = jax.random.normal(k1, (B, D), dtype=jnp.float32)
    x_j = jax.random.normal(k2, (B, D), dtype=jnp.float32)

    loss = contrast_loss(x_i, x_j, temperature=0.5)
    jax.block_until_ready(loss)

    ref = _contrast_ref(x_i, x_j, temperature=0.5)
    assert jnp.allclose(loss, ref, rtol=1e-4, atol=1e-4), (float(loss), float(ref))
    print("KERNEL_OK")
</pallas_src>

<mosaic_0001>
module attributes {stable_mosaic.version = 11 : i64} {
  func.func @_prep_kernel(%arg0: i32, %arg1: memref<4x32xf32, #tpu.memory_space<vmem>>, %arg2: memref<4x32xf32, #tpu.memory_space<vmem>>, %arg3: memref<4x32xf32, #tpu.memory_space<vmem>>, %arg4: memref<4x32xf32, #tpu.memory_space<vmem>>, %arg5: memref<4x1xf32, #tpu.memory_space<vmem>>, %arg6: memref<4x1xf32, #tpu.memory_space<vmem>>, %arg7: memref<4x1xf32, #tpu.memory_space<vmem>>) attributes {dimension_semantics = [#tpu.dimension_semantics<parallel>], iteration_bounds = array<i64: 1>, scalar_prefetch = 0 : i64, scratch_operands = 0 : i64, tpu.core_type = #tpu.core_type<tc>, window_params = [{transform_indices = @transform_0, window_bounds = array<i64: 4, 32>}, {transform_indices = @transform_1, window_bounds = array<i64: 4, 32>}, {transform_indices = @transform_2, window_bounds = array<i64: 4, 32>}, {transform_indices = @transform_3, window_bounds = array<i64: 4, 32>}, {transform_indices = @transform_4, window_bounds = array<i64: 4, 1>}, {transform_indices = @transform_5, window_bounds = array<i64: 4, 1>}, {transform_indices = @transform_6, window_bounds = array<i64: 4, 1>}]} {
    %c0 = arith.constant 0 : index
    %c0_0 = arith.constant 0 : index
    %0 = vector.load %arg1[%c0, %c0_0] : memref<4x32xf32, #tpu.memory_space<vmem>>, vector<4x32xf32>
    %c0_1 = arith.constant 0 : index
    %c0_2 = arith.constant 0 : index
    %1 = vector.load %arg2[%c0_1, %c0_2] : memref<4x32xf32, #tpu.memory_space<vmem>>, vector<4x32xf32>
    %2 = arith.mulf %0, %0 : vector<4x32xf32>
    %cst = arith.constant dense<0.000000e+00> : vector<4xf32>
    %3 = vector.multi_reduction <add>, %2, %cst [1] : vector<4x32xf32> to vector<4xf32>
    %4 = vector.shape_cast %3 : vector<4xf32> to vector<4x1xf32>
    %cst_3 = arith.constant 1.000000e-24 : f32
    %5 = vector.broadcast %cst_3 : f32 to vector<4x1xf32>
    %6 = arith.maximumf %4, %5 : vector<4x1xf32>
    %7 = math.rsqrt %6 : vector<4x1xf32>
    %cst_4 = arith.constant 1.41421354 : f32
    %8 = vector.broadcast %cst_4 : f32 to vector<4x1xf32>
    %9 = arith.mulf %7, %8 : vector<4x1xf32>
    %10 = vector.broadcast %9 : vector<4x1xf32> to vector<4x32xf32>
    %11 = arith.mulf %0, %10 : vector<4x32xf32>
    %12 = arith.mulf %1, %1 : vector<4x32xf32>
    %cst_5 = arith.constant dense<0.000000e+00> : vector<4xf32>
    %13 = vector.multi_reduction <add>, %12, %cst_5 [1] : vector<4x32xf32> to vector<4xf32>
    %14 = vector.shape_cast %13 : vector<4xf32> to vector<4x1xf32>
    %cst_6 = arith.constant 1.000000e-24 : f32
    %15 = vector.broadcast %cst_6 : f32 to vector<4x1xf32>
    %16 = arith.maximumf %14, %15 : vector<4x1xf32>
    %17 = math.rsqrt %16 : vector<4x1xf32>
    %cst_7 = arith.constant 1.41421354 : f32
    %18 = vector.broadcast %cst_7 : f32 to vector<4x1xf32>
    %19 = arith.mulf %17, %18 : vector<4x1xf32>
    %20 = vector.broadcast %19 : vector<4x1xf32> to vector<4x32xf32>
    %21 = arith.mulf %1, %20 : vector<4x32xf32>
    %c0_8 = arith.constant 0 : index
    %c0_9 = arith.constant 0 : index
    %22 = vector.load %arg3[%c0_8, %c0_9] : memref<4x32xf32, #tpu.memory_space<vmem>>, vector<4x32xf32>
    tpu.vector_store %arg3[%c0_8, %c0_9], %11 {strides = array<i32>} : memref<4x32xf32, #tpu.memory_space<vmem>>, vector<4x32xf32>,
    %c0_10 = arith.constant 0 : index
    %c0_11 = arith.constant 0 : index
    %23 = vector.load %arg4[%c0_10, %c0_11] : memref<4x32xf32, #tpu.memory_space<vmem>>, vector<4x32xf32>
    tpu.vector_store %arg4[%c0_10, %c0_11], %21 {strides = array<i32>} : memref<4x32xf32, #tpu.memory_space<vmem>>, vector<4x32xf32>,
    %24 = arith.mulf %11, %21 : vector<4x32xf32>
    %cst_12 = arith.constant dense<0.000000e+00> : vector<4xf32>
    %25 = vector.multi_reduction <add>, %24, %cst_12 [1] : vector<4x32xf32> to vector<4xf32>
    %26 = vector.shape_cast %25 : vector<4xf32> to vector<4x1xf32>
    %c0_13 = arith.constant 0 : index
    %c0_14 = arith.constant 0 : index
    %27 = vector.load %arg5[%c0_13, %c0_14] : memref<4x1xf32, #tpu.memory_space<vmem>>, vector<4x1xf32>
    tpu.vector_store %arg5[%c0_13, %c0_14], %26 {strides = array<i32>} : memref<4x1xf32, #tpu.memory_space<vmem>>, vector<4x1xf32>,
    %28 = arith.mulf %11, %11 : vector<4x32xf32>
    %cst_15 = arith.constant dense<0.000000e+00> : vector<4xf32>
    %29 = vector.multi_reduction <add>, %28, %cst_15 [1] : vector<4x32xf32> to vector<4xf32>
    %30 = vector.shape_cast %29 : vector<4xf32> to vector<4x1xf32>
    %c0_16 = arith.constant 0 : index
    %c0_17 = arith.constant 0 : index
    %31 = vector.load %arg6[%c0_16, %c0_17] : memref<4x1xf32, #tpu.memory_space<vmem>>, vector<4x1xf32>
    tpu.vector_store %arg6[%c0_16, %c0_17], %30 {strides = array<i32>} : memref<4x1xf32, #tpu.memory_space<vmem>>, vector<4x1xf32>,
    %32 = arith.mulf %21, %21 : vector<4x32xf32>
    %cst_18 = arith.constant dense<0.000000e+00> : vector<4xf32>
    %33 = vector.multi_reduction <add>, %32, %cst_18 [1] : vector<4x32xf32> to vector<4xf32>
    %34 = vector.shape_cast %33 : vector<4xf32> to vector<4x1xf32>
    %c0_19 = arith.constant 0 : index
    %c0_20 = arith.constant 0 : index
    %35 = vector.load %arg7[%c0_19, %c0_20] : memref<4x1xf32, #tpu.memory_space<vmem>>, vector<4x1xf32>
    tpu.vector_store %arg7[%c0_19, %c0_20], %34 {strides = array<i32>} : memref<4x1xf32, #tpu.memory_space<vmem>>, vector<4x1xf32>,
    return
  }
  func.func @transform_0(%arg0: i32) -> (i32, i32) {
    %c0_i32 = arith.constant 0 : i32
    %c0_i32_0 = arith.constant 0 : i32
    return %arg0, %c0_i32 : i32, i32
  }
  func.func @transform_1(%arg0: i32) -> (i32, i32) {
    %c0_i32 = arith.constant 0 : i32
    %c0_i32_0 = arith.constant 0 : i32
    return %arg0, %c0_i32 : i32, i32
  }
  func.func @transform_2(%arg0: i32) -> (i32, i32) {
    %c0_i32 = arith.constant 0 : i32
    %c0_i32_0 = arith.constant 0 : i32
    return %arg0, %c0_i32 : i32, i32
  }
  func.func @transform_3(%arg0: i32) -> (i32, i32) {
    %c0_i32 = arith.constant 0 : i32
    %c0_i32_0 = arith.constant 0 : i32
    return %arg0, %c0_i32 : i32, i32
  }
  func.func @transform_4(%arg0: i32) -> (i32, i32) {
    %c0_i32 = arith.constant 0 : i32
    %c0_i32_0 = arith.constant 0 : i32
    return %arg0, %c0_i32 : i32, i32
  }
  func.func @transform_5(%arg0: i32) -> (i32, i32) {
    %c0_i32 = arith.constant 0 : i32
    %c0_i32_0 = arith.constant 0 : i32
    return %arg0, %c0_i32 : i32, i32
  }
  func.func @transform_6(%arg0: i32) -> (i32, i32) {
    %c0_i32 = arith.constant 0 : i32
    %c0_i32_0 = arith.constant 0 : i32
    return %arg0, %c0_i32 : i32, i32
  }
}

</mosaic_0001>

<bundles_post_ra>
// kernel: tpu_custom_call.1
= control target key start
LH: loop header
LB: loop body
LE: loop exit
PB: predicated region body
PF: predicated region fallthrough
CT: control target
= control target key end

     0   :  { %12 = vsyncpa [#allocation3], 0  ;;  %s326_s0 = inlined_call_operand.hbm [shape: f32[4,32], index: 0, kind: input, shape index: {}]   ;;  %s327_s1 = inlined_call_operand.hbm [shape: f32[4,32], index: 1, kind: input, shape index: {}]   ;;  %s328_s2 = inlined_call_operand.hbm [shape: f32[4,32], index: 2, kind: output, shape index: {0}]   ;;  %s329_s3 = inlined_call_operand.hbm [shape: f32[4,32], index: 3, kind: output, shape index: {1}]   ;;  %s330_s4 = inlined_call_operand.vmem [shape: f32[4,1], index: 4, kind: output, shape index: {2}]   ;;  %s331_s5 = inlined_call_operand.vmem [shape: f32[4,1], index: 5, kind: output, shape index: {3}]   ;;  %s332_s6 = inlined_call_operand.vmem [shape: f32[4,1], index: 6, kind: output, shape index: {4}]  }
   0x1   :  { %13 = vsyncpa [#allocation6], 0 }
   0x2   :  { %14 = vsyncpa [#allocation4], 0 }
   0x3   :  { %15 = vsyncpa [#allocation9], 0  ;;  %s21_s23 = sshll.u32 %s326_s0, 4  ;;  %s259_s24 = smov [#allocation2]   ;;  %s22_s23 = int_to_ptr.hbm [resolvable:$true] %s21_s23 }
   0x4   :  { %s23_s25 = sshll.u32 %s259_s24, 4  ;;  %s32_s28 = sshll.u32 %s327_s1, 4  ;;  %s24_s25 = int_to_ptr.vmem [resolvable:$true] %s23_s25  ;;  %s33_s28 = int_to_ptr.hbm [resolvable:$true] %s32_s28 }
   0x5   :  { %26 = dma.hbm_to_vmem [thread:$0]  %s22_s23, 64, %s24_s25, [#allocation3]  }
   0x6   :  { %s260_s29 = smov [#allocation5]  }
   0x7   :  { %s34_s30 = sshll.u32 %s260_s29, 4  ;;  %s35_s30 = int_to_ptr.vmem [resolvable:$true] %s34_s30 }
   0x8   :  { %37 = dma.hbm_to_vmem [thread:$0]  %s33_s28, 64, %s35_s30, [#allocation6]  }
   0x9   :  { %251 = dma.done.wait [#allocation3], 64  }
   0xa   :  { %252 = vsyncadd [#allocation3], 4294967232 }
   0xb   :  { %253 = dma.done.wait [#allocation6], 64  }
   0xc   :  { %254 = vsyncadd [#allocation6], 4294967232  ;;  %v46_v0 = vld [vmem:[#allocation2] sm:$0xf]  ;;  %vm49_vm0 = vcmask 257024   ;;  %s261_s0 = smov [#allocation7]  }
   0xd   :  { %v48_v1 = vmul.f32 %v46_v0, %v46_v0  ;;  %v47_v2 = vld [vmem:[#allocation5] sm:$0xf]  ;;  %s106_s1 = sshll.u32 %s261_s0, 4  ;;  %s108_s9 = sshll.u32 %s328_s2, 4  ;;  %vm89_vm7 = vcmask 3072   ;;  %s107_s1 = int_to_ptr.vmem [resolvable:$true] %s106_s1  ;;  %s109_s9 = int_to_ptr.hbm [resolvable:$true] %s108_s9 }
   0xe   :  { %v66_v4 = vmul.f32 %v47_v2, %v47_v2  ;;  %s262_s10 = smov [#allocation8]   ;;  %s119_s14 = sshll.u32 %s329_s3, 4  ;;  %s120_s14 = int_to_ptr.hbm [resolvable:$true] %s119_s14 }
   0xf   :  { %v50_v3 = vsel %vm49_vm0, %v48_v1, 0.0  ;;  %s117_s11 = sshll.u32 %s262_s10, 4  ;;  %s118_s11 = int_to_ptr.vmem [resolvable:$true] %s117_s11 }
  0x10   :  { %51 = vadd.xlane.f32.xlu0 %v50_v3  ;;  %v67_v5 = vsel %vm49_vm0, %v66_v4, 0.0 }
  0x18   :  { %68 = vadd.xlane.f32.xlu0 %v67_v5 }
  0x83   :  { %v52_v6 = vpop.xlane.xlu0 %51 }
  0x84   :  { %v53_v7 = vmax.f32 %v52_v6, 1e-24 }
  0x86   :  { %151 = vrsqrt.f32 %v53_v7  ;;  %vm60_vm2 = vweird.f32 %v53_v7 }
  0x8b   :  { %v69_v8 = vpop.xlane.xlu0 %68 }
  0x8c   :  { %v152_v9 = vpop.eup %151  ;;  %v70_v10 = vmax.f32 %v69_v8, 1e-24 }
  0x8d   :  { %v55_v11 = vmul.f32 %v152_v9, %v53_v7  ;;  %vm61_vm1 = vweird.f32 %v152_v9 }
  0x8e   :  { %153 = vrsqrt.f32 %v70_v10  ;;  %vm62_vm3 = vmor %vm60_vm2, %vm61_vm1  ;;  %vm77_vm5 = vweird.f32 %v70_v10 }
  0x8f   :  { %v56_v12 = vmul.f32 %v152_v9, %v55_v11 }
  0x91   :  { %v57_v13 = vmul.f32 0.5, %v56_v12 }
  0x93   :  { %v58_v14 = vsub.f32 1.5, %v57_v13 }
  0x94   :  { %v154_v15 = vpop.eup %153 }
  0x95   :  { %v59_v16 = vmul.f32 %v152_v9, %v58_v14  ;;  %v72_v17 = vmul.f32 %v154_v15, %v70_v10  ;;  %vm78_vm4 = vweird.f32 %v154_v15 }
  0x96   :  { %vm79_vm6 = vmor %vm77_vm5, %vm78_vm4 }
  0x97   :  { %v63_v18 = vsel %vm62_vm3, %v152_v9, %v59_v16  ;;  %v73_v19 = vmul.f32 %v154_v15, %v72_v17 }
  0x98   :  { %v64_v20 = vmul.f32 1.4142135, %v63_v18 }
  0x99   :  { %v74_v21 = vmul.f32 0.5, %v73_v19 }
  0x9a   :  { %v65_v22 = vmul.f32 %v64_v20, %v46_v0 }
  0x9b   :  { %v75_v23 = vsub.f32 1.5, %v74_v21 }
  0x9c   :  { %83 = vst.msk [vmem:[#allocation7] sm:$0xf] %vm49_vm0, %v65_v22  ;;  %v91_v32 = vmul.f32 %v65_v22, %v65_v22 }
  0x9d   :  { %v76_v24 = vmul.f32 %v154_v15, %v75_v23  ;;  %111 = dma.vmem_to_hbm [thread:$0]  %s107_s1, 64, %s109_s9, [#allocation4]  }
  0x9e   :  { %v92_v33 = vsel %vm49_vm0, %v91_v32, 0.0 }
  0x9f   :  { %v80_v25 = vsel %vm79_vm6, %v154_v15, %v76_v24 }
  0xa0   :  { %v81_v26 = vmul.f32 1.4142135, %v80_v25 }
  0xa2   :  { %v82_v27 = vmul.f32 %v81_v26, %v47_v2 }
  0xa4   :  { %v96_v28 = vmul.f32 %v82_v27, %v82_v27  ;;  %84 = vst.msk [vmem:[#allocation8] sm:$0xf] %vm49_vm0, %v82_v27  ;;  %v85_v29 = vmul.f32 %v82_v27, %v65_v22 }
  0xa5   :  { %122 = dma.vmem_to_hbm [thread:$0]  %s118_s11, 64, %s120_s14, [#allocation9]  }
  0xa6   :  { %v97_v30 = vsel %vm49_vm0, %v96_v28, 0.0  ;;  %v86_v31 = vsel %vm49_vm0, %v85_v29, 0.0 }
  0xa7   :  { %98 = vadd.xlane.f32.xlu2 %v97_v30  ;;  %87 = vadd.xlane.f32.xlu1 %v86_v31 }
  0xaf   :  { %93 = vadd.xlane.f32.xlu1 %v92_v33 }
 0x11a   :  { %v99_v34 = vpop.xlane.xlu2 %98  ;;  %v88_v35 = vpop.xlane.xlu1 %87 }
 0x11b   :  { %100 = vst.msk [vmem:[%s332_s6] sm:$0xf] %vm89_vm7, %v99_v34 }
 0x11c   :  { %90 = vst.msk [vmem:[%s330_s4] sm:$0xf] %vm89_vm7, %v88_v35 }
 0x122   :  { %v94_v36 = vpop.xlane.xlu1 %93 }
 0x123   :  { %95 = vst.msk [vmem:[%s331_s5] sm:$0xf] %vm89_vm7, %v94_v36 }
 0x124   :  { %255 = dma.done.wait [#allocation4], 64  }
 0x125   :  { %256 = vsyncadd [#allocation4], 4294967232 }
 0x126   :  { %257 = dma.done.wait [#allocation9], 64  }
 0x127   :  { %258 = vsyncadd [#allocation9], 4294967232 }
 0x128   :  { %143 = vsyncpa [#allocation3], 1 }
 0x129   :  { %144 = vsyncpa [#allocation6], 1 }
 0x12a   :  { %145 = vsyncpa [#allocation4], 1 }
 0x12b   :  { %146 = vsyncpa [#allocation9], 1 }

</bundles_post_ra>
